<compile_context>
chip_gen: v7x
topology: tpu7x:2x2x1
jax: 0.10.0
libtpu: 0.0.40
codegen_flags: <defaults>
</compile_context>

<pallas_src>
import jax
import jax.numpy as jnp
from jax.experimental import pallas as pl
from jax.experimental.pallas import tpu as pltpu


def _round_up(x, m):
    return ((x + m - 1) // m) * m


def _ada_rms_mlp_kernel(x_ref, w1_ref, b1_ref, w2_ref, b2_ref,
                        alpha_ref, beta_ref, acc_ref):
    """Grid = (M tiles, H tiles).  Per (i, h) step:
         acc += silu(x_i @ w1[:, h] + b1[h]) @ w2[h, :]
       At the last h step add b2 and write the alpha / beta halves."""
    h_idx = pl.program_id(1)

    @pl.when(h_idx == 0)
    def _init():
        acc_ref[...] = jnp.zeros_like(acc_ref)

    hid = jnp.dot(x_ref[...], w1_ref[...], preferred_element_type=jnp.float32)
    hid = hid + b1_ref[...].astype(jnp.float32)
    hid = hid * jax.nn.sigmoid(hid)            # SiLU in f32; sigmoid -> EUP slot
    hid = hid.astype(w2_ref.dtype)             # operand dtype for the second MXU pass
    acc_ref[...] += jnp.dot(hid, w2_ref[...], preferred_element_type=jnp.float32)

    @pl.when(h_idx == pl.num_programs(1) - 1)
    def _finalize():
        out = acc_ref[...] + b2_ref[...].astype(jnp.float32)
        d = alpha_ref.shape[-1]
        alpha_ref[...] = out[:, :d].astype(alpha_ref.dtype)
        beta_ref[...] = out[:, d:].astype(beta_ref.dtype)


def ada_rms_params(cond, w1, b1, w2, b2, *, tm=256, th=512, mxu_dtype=None):
    """cond: (B, d).  w1: (d, 4d), b1: (4d,), w2: (4d, 2d), b2: (2d,).
    Returns (alpha, beta), each (B, 1, d)."""
    B, d_in = cond.shape
    d_hidden = w1.shape[1]
    d_out = w2.shape[1]
    assert w1.shape == (d_in, d_hidden) and b1.shape == (d_hidden,)
    assert w2.shape == (d_hidden, d_out) and b2.shape == (d_out,)
    assert d_out % 2 == 0
    d_model = d_out // 2
    N = d_out                                   # alpha || beta, split in-kernel

    # ---- M (batch) tiling: balanced tiles, minimal padding waste ----------
    is_bf16 = (mxu_dtype == jnp.bfloat16) or (cond.dtype == jnp.bfloat16)
    sublane = 16 if is_bf16 else 8
    n_m = max(1, -(-B // tm))
    tm_eff = _round_up(-(-B // n_m), sublane)
    M = tm_eff * n_m

    # ---- H (hidden) tiling: bounds VMEM (v7x has 64 MiB / TC) -------------
    if d_hidden <= th:
        th_eff, Hp = d_hidden, d_hidden         # single tile, no hidden padding
    else:
        th_eff = th                             # multiple of 256 -> MXU friendly
        Hp = _round_up(d_hidden, th_eff)
    n_h = Hp // th_eff

    # ---- per-call padding: batch rows always; hidden only if unaligned ----
    x_p = cond if M == B else jnp.pad(cond, ((0, M - B), (0, 0)))
    # TODO(synk): in production pre-pad / pre-layout the weights once at init;
    # the per-call pad below only triggers when 4*d_model % th != 0.
    w1_p = w1 if Hp == d_hidden else jnp.pad(w1, ((0, 0), (0, Hp - d_hidden)))
    b1_p = (b1 if Hp == d_hidden else jnp.pad(b1, (0, Hp - d_hidden))).reshape(1, Hp)
    w2_p = w2 if Hp == d_hidden else jnp.pad(w2, ((0, Hp - d_hidden), (0, 0)))
    b2_p = b2.reshape(1, N)

    if mxu_dtype is not None:                   # bf16 operands: ~2-3x MXU rate,
        x_p = x_p.astype(mxu_dtype)             # half the weight HBM bytes.
        w1_p = w1_p.astype(mxu_dtype)
        w2_p = w2_p.astype(mxu_dtype)

    out_dtype = cond.dtype

    # ---- VMEM budget: real footprint + headroom, never the full v7x 64 MiB
    est = (2 * tm_eff * d_in * x_p.dtype.itemsize          # x (double-buffered)
           + 2 * d_in * th_eff * w1_p.dtype.itemsize       # w1 tile
           + 2 * th_eff * b1_p.dtype.itemsize              # b1 tile
           + 2 * th_eff * N * w2_p.dtype.itemsize          # w2 tile
           + N * b2_p.dtype.itemsize                       # b2 (Buffered(1))
           + tm_eff * N * 4                                # f32 accumulator
           + 2 * 2 * tm_eff * d_model * cond.dtype.itemsize)  # alpha/beta blocks
    vmem_limit = int(min(56 * 2**20, max(32 * 2**20, int(est * 1.5) + 4 * 2**20)))

    alpha, beta = pl.pallas_call(
        _ada_rms_mlp_kernel,
        out_shape=(jax.ShapeDtypeStruct((M, d_model), out_dtype),
                   jax.ShapeDtypeStruct((M, d_model), out_dtype)),
        grid_spec=pltpu.PrefetchScalarGridSpec(
            num_scalar_prefetch=0,
            grid=(n_m, n_h),                    # reduction (H) axis last
            in_specs=[
                pl.BlockSpec((tm_eff, d_in), lambda i, h: (i, 0)),
                pl.BlockSpec((d_in, th_eff), lambda i, h: (0, h)),
                pl.BlockSpec((1, th_eff), lambda i, h: (0, h)),
                pl.BlockSpec((th_eff, N), lambda i, h: (h, 0)),
                pl.BlockSpec((1, N), lambda i, h: (0, 0),
                             pipeline_mode=pl.Buffered(1)),   # grid-invariant
            ],
            out_specs=[
                pl.BlockSpec((tm_eff, d_model), lambda i, h: (i, 0)),
                pl.BlockSpec((tm_eff, d_model), lambda i, h: (i, 0)),
            ],
            scratch_shapes=[pltpu.VMEM((tm_eff, N), jnp.float32)],
        ),
        compiler_params=pltpu.CompilerParams(
            dimension_semantics=("parallel", "arbitrary"),
            vmem_limit_bytes=vmem_limit,
        ),
    )(x_p, w1_p, b1_p, w2_p, b2_p)

    # Only padded rows are trimmed; alpha/beta halves were split in-kernel.
    return alpha[:B, None, :], beta[:B, None, :]


def _reference(cond, w1, b1, w2, b2):
    h = jnp.dot(cond, w1) + b1
    h = h * jax.nn.sigmoid(h)                   # SiLU
    p = jnp.dot(h, w2) + b2
    d = p.shape[-1] // 2
    return p[:, None, :d], p[:, None, d:]


if __name__ == "__main__":
    def make_inputs(key, batch, d_model):
        kc, k1, kb1, k2, kb2 = jax.random.split(key, 5)
        cond = jax.random.normal(kc, (batch, d_model), jnp.float32)
        w1 = jax.random.normal(k1, (d_model, 4 * d_model), jnp.float32) * 0.05
        b1 = jax.random.normal(kb1, (4 * d_model,), jnp.float32) * 0.05
        w2 = jax.random.normal(k2, (4 * d_model, 2 * d_model), jnp.float32) * 0.05
        b2 = jax.random.normal(kb2, (2 * d_model,), jnp.float32) * 0.05
        return cond, w1, b1, w2, b2

    key = jax.random.PRNGKey(0)
    ka, kb = jax.random.split(key)

    # 1) small f32 case (single hidden tile, batch padded 4 -> 8 rows)
    args1 = make_inputs(ka, batch=4, d_model=32)
    a1, b1o = jax.block_until_ready(ada_rms_params(*args1))
    a1r, b1r = _reference(*args1)
    assert a1.shape == (4, 1, 32) and b1o.shape == (4, 1, 32)
    assert jnp.allclose(a1, a1r, atol=2e-2, rtol=2e-2), "alpha mismatch (f32 small)"
    assert jnp.allclose(b1o, b1r, atol=2e-2, rtol=2e-2), "beta mismatch (f32 small)"

    # 2) hidden-tiled + padded case: d_hidden=640 tiled with th=256 (3 steps),
    #    batch padded 20 -> 24 rows, exercises the accumulator path.
    args2 = make_inputs(kb, batch=20, d_model=160)
    a2, b2o = jax.block_until_ready(ada_rms_params(*args2, tm=256, th=256))
    a2r, b2r = _reference(*args2)
    assert a2.shape == (20, 1, 160) and b2o.shape == (20, 1, 160)
    assert jnp.allclose(a2, a2r, atol=2e-2, rtol=2e-2), "alpha mismatch (H-tiled)"
    assert jnp.allclose(b2o, b2r, atol=2e-2, rtol=2e-2), "beta mismatch (H-tiled)"

    # 3) bf16 MXU-operand path (f32 accumulation, f32 outputs) on the small case
    a3, b3 = jax.block_until_ready(ada_rms_params(*args1, mxu_dtype=jnp.bfloat16))
    assert jnp.allclose(a3, a1r, atol=1e-1, rtol=1e-1), "alpha mismatch (bf16)"
    assert jnp.allclose(b3, b1r, atol=1e-1, rtol=1e-1), "beta mismatch (bf16)"

    print("KERNEL_OK")
</pallas_src>

<mosaic_0001>
module attributes {stable_mosaic.version = 11 : i64} {
  func.func @_ada_rms_mlp_kernel(%arg0: i32, %arg1: i32, %arg2: memref<8x32xf32, #tpu.memory_space<vmem>>, %arg3: memref<32x128xf32, #tpu.memory_space<vmem>>, %arg4: memref<1x128xf32, #tpu.memory_space<vmem>>, %arg5: memref<128x64xf32, #tpu.memory_space<vmem>>, %arg6: memref<1x64xf32, #tpu.memory_space<vmem>>, %arg7: memref<8x32xf32, #tpu.memory_space<vmem>>, %arg8: memref<8x32xf32, #tpu.memory_space<vmem>>, %arg9: memref<8x64xf32, #tpu.memory_space<vmem>>) attributes {dimension_semantics = [#tpu.dimension_semantics<parallel>, #tpu.dimension_semantics<arbitrary>], iteration_bounds = array<i64: 1, 1>, scalar_prefetch = 0 : i64, scratch_operands = 1 : i64, tpu.core_type = #tpu.core_type<tc>, window_params = [{transform_indices = @transform_0, window_bounds = array<i64: 8, 32>}, {transform_indices = @transform_1, window_bounds = array<i64: 32, 128>}, {transform_indices = @transform_2, window_bounds = array<i64: 1, 128>}, {transform_indices = @transform_3, window_bounds = array<i64: 128, 64>}, {pipeline_mode = #tpu.pipeline_mode<synchronous>, transform_indices = @transform_4, window_bounds = array<i64: 1, 64>}, {transform_indices = @transform_5, window_bounds = array<i64: 8, 32>}, {transform_indices = @transform_6, window_bounds = array<i64: 8, 32>}]} {
    %c0_i32 = arith.constant 0 : i32
    %0 = arith.cmpi eq, %arg1, %c0_i32 : i32
    %1 = arith.extui %0 : i1 to i32
    %c0_i32_0 = arith.constant 0 : i32
    %2 = arith.cmpi ne, %1, %c0_i32_0 : i32
    scf.if %2 {
      %cst_16 = arith.constant 0.000000e+00 : f32
      %23 = vector.broadcast %cst_16 : f32 to vector<8x64xf32>
      %c0_17 = arith.constant 0 : index
      %c0_18 = arith.constant 0 : index
      %24 = vector.load %arg9[%c0_17, %c0_18] : memref<8x64xf32, #tpu.memory_space<vmem>>, vector<8x64xf32>
      tpu.vector_store %arg9[%c0_17, %c0_18], %23 {strides = array<i32>} : memref<8x64xf32, #tpu.memory_space<vmem>>, vector<8x64xf32>,
    } else {
    }
    %c0 = arith.constant 0 : index
    %c0_1 = arith.constant 0 : index
    %3 = vector.load %arg2[%c0, %c0_1] : memref<8x32xf32, #tpu.memory_space<vmem>>, vector<8x32xf32>
    %c0_2 = arith.constant 0 : index
    %c0_3 = arith.constant 0 : index
    %4 = vector.load %arg3[%c0_2, %c0_3] : memref<32x128xf32, #tpu.memory_space<vmem>>, vector<32x128xf32>
    %cst = arith.constant dense<0.000000e+00> : vector<8x128xf32>
    %5 = tpu.matmul %3, %4, %cst {dimension_numbers = #tpu.dot_dimension_numbers<[1], [0], [0], [1], [0, 0, 1, 1], [], []>} : vector<8x32xf32>, vector<32x128xf32>, vector<8x128xf32> -> vector<8x128xf32>
    %c0_4 = arith.constant 0 : index
    %c0_5 = arith.constant 0 : index
    %6 = vector.load %arg4[%c0_4, %c0_5] : memref<1x128xf32, #tpu.memory_space<vmem>>, vector<1x128xf32>
    %7 = vector.broadcast %6 : vector<1x128xf32> to vector<8x128xf32>
    %8 = arith.addf %5, %7 : vector<8x128xf32>
    %9 = arith.negf %8 : vector<8x128xf32>
    %10 = math.exp %9 : vector<8x128xf32>
    %cst_6 = arith.constant 1.000000e+00 : f32
    %11 = vector.broadcast %cst_6 : f32 to vector<8x128xf32>
    %12 = arith.addf %11, %10 : vector<8x128xf32>
    %13 = arith.divf %11, %12 : vector<8x128xf32>
    %14 = arith.mulf %8, %13 : vector<8x128xf32>
    %c0_7 = arith.constant 0 : index
    %c0_8 = arith.constant 0 : index
    %15 = vector.load %arg9[%c0_7, %c0_8] : memref<8x64xf32, #tpu.memory_space<vmem>>, vector<8x64xf32>
    %c0_9 = arith.constant 0 : index
    %c0_10 = arith.constant 0 : index
    %16 = vector.load %arg5[%c0_9, %c0_10] : memref<128x64xf32, #tpu.memory_space<vmem>>, vector<128x64xf32>
    %cst_11 = arith.constant dense<0.000000e+00> : vector<8x64xf32>
    %17 = tpu.matmul %14, %16, %cst_11 {dimension_numbers = #tpu.dot_dimension_numbers<[1], [0], [0], [1], [0, 0, 1, 1], [], []>} : vector<8x128xf32>, vector<128x64xf32>, vector<8x64xf32> -> vector<8x64xf32>
    %18 = arith.addf %15, %17 : vector<8x64xf32>
    %c0_12 = arith.constant 0 : index
    %c0_13 = arith.constant 0 : index
    %19 = vector.load %arg9[%c0_12, %c0_13] : memref<8x64xf32, #tpu.memory_space<vmem>>, vector<8x64xf32>
    tpu.vector_store %arg9[%c0_12, %c0_13], %18 {strides = array<i32>} : memref<8x64xf32, #tpu.memory_space<vmem>>, vector<8x64xf32>,
    %c0_i32_14 = arith.constant 0 : i32
    %20 = arith.cmpi eq, %arg1, %c0_i32_14 : i32
    %21 = arith.extui %20 : i1 to i32
    %c0_i32_15 = arith.constant 0 : i32
    %22 = arith.cmpi ne, %21, %c0_i32_15 : i32
    scf.if %22 {
      %c0_16 = arith.constant 0 : index
      %c0_17 = arith.constant 0 : index
      %23 = vector.load %arg9[%c0_16, %c0_17] : memref<8x64xf32, #tpu.memory_space<vmem>>, vector<8x64xf32>
      %c0_18 = arith.constant 0 : index
      %c0_19 = arith.constant 0 : index
      %24 = vector.load %arg6[%c0_18, %c0_19] : memref<1x64xf32, #tpu.memory_space<vmem>>, vector<1x64xf32>
      %25 = vector.broadcast %24 : vector<1x64xf32> to vector<8x64xf32>
      %26 = arith.addf %23, %25 : vector<8x64xf32>
      %27 = vector.extract_strided_slice %26 {offsets = [0, 0], sizes = [8, 32], strides = [1, 1]} : vector<8x64xf32> to vector<8x32xf32>
      %c0_20 = arith.constant 0 : index
      %c0_21 = arith.constant 0 : index
      %28 = vector.load %arg7[%c0_20, %c0_21] : memref<8x32xf32, #tpu.memory_space<vmem>>, vector<8x32xf32>
      tpu.vector_store %arg7[%c0_20, %c0_21], %27 {strides = array<i32>} : memref<8x32xf32, #tpu.memory_space<vmem>>, vector<8x32xf32>,
      %29 = vector.extract_strided_slice %26 {offsets = [0, 32], sizes = [8, 32], strides = [1, 1]} : vector<8x64xf32> to vector<8x32xf32>
      %c0_22 = arith.constant 0 : index
      %c0_23 = arith.constant 0 : index
      %30 = vector.load %arg8[%c0_22, %c0_23] : memref<8x32xf32, #tpu.memory_space<vmem>>, vector<8x32xf32>
      tpu.vector_store %arg8[%c0_22, %c0_23], %29 {strides = array<i32>} : memref<8x32xf32, #tpu.memory_space<vmem>>, vector<8x32xf32>,
    } else {
    }
    return
  }
  func.func @transform_0(%arg0: i32, %arg1: i32) -> (i32, i32) {
    %c0_i32 = arith.constant 0 : i32
    %c0_i32_0 = arith.constant 0 : i32
    return %arg0, %c0_i32 : i32, i32
  }
  func.func @transform_1(%arg0: i32, %arg1: i32) -> (i32, i32) {
    %c0_i32 = arith.constant 0 : i32
    %c0_i32_0 = arith.constant 0 : i32
    return %c0_i32, %arg1 : i32, i32
  }
  func.func @transform_2(%arg0: i32, %arg1: i32) -> (i32, i32) {
    %c0_i32 = arith.constant 0 : i32
    %c0_i32_0 = arith.constant 0 : i32
    return %c0_i32, %arg1 : i32, i32
  }
  func.func @transform_3(%arg0: i32, %arg1: i32) -> (i32, i32) {
    %c0_i32 = arith.constant 0 : i32
    %c0_i32_0 = arith.constant 0 : i32
    return %arg1, %c0_i32 : i32, i32
  }
  func.func @transform_4(%arg0: i32, %arg1: i32) -> (i32, i32) {
    %c0_i32 = arith.constant 0 : i32
    %c0_i32_0 = arith.constant 0 : i32
    %c0_i32_1 = arith.constant 0 : i32
    return %c0_i32, %c0_i32_0 : i32, i32
  }
  func.func @transform_5(%arg0: i32, %arg1: i32) -> (i32, i32) {
    %c0_i32 = arith.constant 0 : i32
    %c0_i32_0 = arith.constant 0 : i32
    return %arg0, %c0_i32 : i32, i32
  }
  func.func @transform_6(%arg0: i32, %arg1: i32) -> (i32, i32) {
    %c0_i32 = arith.constant 0 : i32
    %c0_i32_0 = arith.constant 0 : i32
    return %arg0, %c0_i32 : i32, i32
  }
}

</mosaic_0001>

<bundles_post_ra>
// kernel: tpu_custom_call.1
= control target key start
LH: loop header
LB: loop body
LE: loop exit
PB: predicated region body
PF: predicated region fallthrough
CT: control target
= control target key end

     0   :  { %12 = vsyncpa [#allocation4], 0  ;;  %vm28_vm0 = vcmask 523264   ;;  %v419_v3 = vmov 0.0|0.0   ;;  %v420_v6 = vmov 0.0   ;;  %vm421_vm1 = vmmov 0   ;;  %s558_s0 = inlined_call_operand.vmem [shape: f32[8,32], index: 0, kind: input, shape index: {}]   ;;  %s559_s1 = inlined_call_operand.vmem [shape: f32[32,128], index: 1, kind: input, shape index: {}]   ;;  %s560_s2 = inlined_call_operand.vmem [shape: f32[1,128], index: 2, kind: input, shape index: {}]   ;;  %s561_s3 = inlined_call_operand.vmem [shape: f32[128,64], index: 3, kind: input, shape index: {}]   ;;  %s562_s4 = inlined_call_operand.vmem [shape: f32[1,64], index: 4, kind: input, shape index: {}]   ;;  %s563_s5 = inlined_call_operand.hbm [shape: f32[8,32], index: 5, kind: output, shape index: {0}]   ;;  %s564_s6 = inlined_call_operand.hbm [shape: f32[8,32], index: 6, kind: output, shape index: {1}]  }
   0x1   :  { %v31_v0 = vld [vmem:[%s559_s1] sm:$0xff]  ;;  %v32_v1 = vld [vmem:[%s559_s1 + $0x8] sm:$0xff]  ;;  %v33_v2 = vld [vmem:[%s559_s1 + $0x10] sm:$0xff]  ;;  %331 = vmatprep.subr.bf16.mxu0 %v419_v3  ;;  %29 = vst.msk [vmem:[#allocation2] sm:$0xff] %vm28_vm0, %v420_v6  ;;  %337 = vmatprep.subr.bf16.mxu1 %v419_v3 }
   0x2   :  { %v332_v4 = vpack.c.bf16 %v32_v1, %v31_v0  ;;  %v34_v5 = vld [vmem:[%s559_s1 + $0x18] sm:$0xff]  ;;  %293 = vmatprep.mubr.msk.f32.mxu0 %vm421_vm1, %v420_v6  ;;  %328 = vmatprep.mubr.msk.f32.mxu1 %vm421_vm1, %v420_v6 }
   0x3   :  { %13 = vsyncpa [#allocation6], 0  ;;  %v335_v7 = vpack.c.bf16 %v34_v5, %v33_v2  ;;  %v30_v8 = vld [vmem:[%s558_s0] sm:$0xff]  ;;  %vm42_vm2 = vcmask 261120   ;;  %v125_v10 = vld [vmem:[%s561_s3 + $0x8] sm:$0xff]  ;;  %s423_s15 = smov 96  }
   0x4   :  { %333 = vmatpush3.bf16.msra.mxu0 %v332_v4  ;;  %v124_v9 = vld [vmem:[%s561_s3] sm:$0xff]  ;;  %v126_v12 = vld [vmem:[%s561_s3 + $0x10] sm:$0xff]  ;;  %v127_v13 = vld [vmem:[%s561_s3 + $0x18] sm:$0xff] }
   0x5   :  { %334 = vmatprep.subr.bf16.mxu0 %v419_v3  ;;  %v338_v11 = vpack.c.bf16 %v125_v10, %v124_v9  ;;  %v341_v14 = vpack.c.bf16 %v127_v13, %v126_v12  ;;  %v128_v15 = vld [vmem:[%s561_s3 + $0x20] sm:$0xff]  ;;  %v129_v16 = vld [vmem:[%s561_s3 + $0x28] sm:$0xff]  ;;  %v130_v18 = vld [vmem:[%s561_s3 + $0x30] sm:$0xff] }
   0x6   :  { %v344_v17 = vpack.c.bf16 %v129_v16, %v128_v15  ;;  %v131_v19 = vld [vmem:[%s561_s3 + $0x38] sm:$0xff]  ;;  %v132_v21 = vld [vmem:[%s561_s3 + $0x40] sm:$0xff]  ;;  %v133_v22 = vld [vmem:[%s561_s3 + $0x48] sm:$0xff] }
   0x7   :  { %339 = vmatpush3.bf16.msra.mxu1 %v338_v11  ;;  %v347_v20 = vpack.c.bf16 %v131_v19, %v130_v18  ;;  %v350_v23 = vpack.c.bf16 %v133_v22, %v132_v21  ;;  %v134_v24 = vld [vmem:[%s561_s3 + $0x50] sm:$0xff]  ;;  %v135_v25 = vld [vmem:[%s561_s3 + $0x58] sm:$0xff]  ;;  %v136_v27 = vld [vmem:[%s561_s3 + $0x60] sm:$0xff] }
   0x8   :  { %336 = vmatpush3.bf16.msra.mxu0 %v335_v7  ;;  %340 = vmatprep.subr.bf16.mxu1 %v419_v3  ;;  %v353_v26 = vpack.c.bf16 %v135_v25, %v134_v24  ;;  %v137_v28 = vld [vmem:[%s561_s3 + $0x68] sm:$0xff]  ;;  %v138_v30 = vld [vmem:[%s561_s3 + $0x70] sm:$0xff]  ;;  %v139_v31 = vld [vmem:[%s561_s3 + $0x78] sm:$0xff] }
   0x9   :  { %v356_v29 = vpack.c.bf16 %v137_v28, %v136_v27  ;;  %v359_v32 = vpack.c.bf16 %v139_v31, %v138_v30  ;;  %v259_v33 = vld [vmem:[%s560_s2] ss:$0 sm:$0xff]  ;;  %s422_s2 = smov [#allocation3]  }
   0xa   :  { %v123_v42 = vld [vmem:[#allocation2] sm:$0xff]  ;;  %s237_s14 = sshll.u32 %s422_s2, 4  ;;  %s238_s14 = int_to_ptr.vmem [resolvable:$true] %s237_s14 }
   0xb   :  { %294 = vmatmul.mubr.msk.f32.vlgmr.msra.gmra.mrb[0].mxu0 %vm42_vm2, %v30_v8  ;;  %342 = vmatpush3.bf16.msra.mxu1 %v341_v14  ;;  %v262_v46 = vld [vmem:[%s562_s4] ss:$0 sm:$0xff]  ;;  %s371_s16 = scalar_lea.vmem %s238_s14, 128  ;;  %p376_p1 = scmp.lt.s32.totalorder %s238_s14, %s238_s14 }
   0xc   :  { %343 = vmatprep.subr.bf16.mxu1 %v419_v3  ;;  %p372_p0 = scmp.ne.s32.totalorder %s238_s14, %s371_s16  ;;  %p377_p2 = scmp.lt.s32.totalorder %s371_s16, %s371_s16 }
   0xe   :  { %p378_p3 = por %p377_p2, %p376_p1 }
   0xf   :  { %345 = vmatpush3.bf16.msra.mxu1 %v344_v17 }
  0x10   :  { %346 = vmatprep.subr.bf16.mxu1 %v419_v3  ;;  %p379_p4 = pnand %p378_p3, %p372_p0 }
  0x13   :  { %348 = vmatpush3.bf16.msra.mxu1 %v347_v20 }
  0x14   :  { %349 = vmatprep.subr.bf16.mxu1 %v419_v3 }
  0x17   :  { %351 = vmatpush3.bf16.msra.mxu1 %v350_v23 }
  0x18   :  { %352 = vmatprep.subr.bf16.mxu1 %v419_v3 }
  0x1b   :  { %354 = vmatpush3.bf16.msra.mxu1 %v353_v26 }
  0x1c   :  { %355 = vmatprep.subr.bf16.mxu1 %v419_v3 }
  0x1f   :  { %357 = vmatpush3.bf16.msra.mxu1 %v356_v29 }
  0x20   :  { %358 = vmatprep.subr.bf16.mxu1 %v419_v3 }
  0x23   :  { %360 = vmatpush3.bf16.msra.mxu1 %v359_v32 }
  0xde   :  { %v112_v34 = vpop.f32.mrb[0].mxu0 }
  0xdf   :  { %v113_v35 = vadd.f32 %v259_v33, %v112_v34  ;;  %v295_v36 = vpop.f32.mrb[1].mxu0 }
  0xe1   :  { %v261_v37 = vmul.f32 -1.442695, %v113_v35 }
  0xe3   :  { %367 = vpow2.f32 %v261_v37 }
  0xed   :  { %v368_v38 = vpop.eup %367 }
  0xee   :  { %v119_v39 = vadd.f32 1.0, %v368_v38 }
  0xf0   :  { %369 = vrcp.f32 %v119_v39 }
  0xfa   :  { %v370_v40 = vpop.eup %369 }
  0xfb   :  { %v122_v41 = vmul.f32 %v370_v40, %v113_v35 }
  0xfd   :  { %329 = vmatmul.mubr.f32.vlgmr.msra.gmra.mrb[0].mxu1 %v122_v41 }
 0x1d0   :  { %v206_v43 = vpop.f32.mrb[0].mxu1 }
 0x1d1   :  { %v210_v44 = vadd.f32 %v206_v43, %v123_v42  ;;  %v330_v45 = vpop.f32.mrb[1].mxu1 }
 0x1d3   :  { %212 = vst.msk [vmem:[#allocation2] sm:$0xff] %vm28_vm0, %v210_v44 }
 0x1da   :  { %v216_v47 = vld [vmem:[#allocation2] sm:$0xff] }
 0x1db   :  { %v224_v48 = vadd.f32 %v262_v46, %v216_v47 }
 0x1dd   :  { %227 = vrot.lane.b32.xlu0 %v224_v48, %s423_s15  ;;  %225 = vst.msk [vmem:[#allocation3] sm:$0xff] %vm42_vm2, %v224_v48 }
 0x1de   :  { %382 = shalt.err (!%p379_p4)
}
 0x1df   :  { %s383_s4 = scalar_lea.hbm %s563_s5, 128 }
 0x1e0   :  { %p384_p5 = scmp.ne.s32.totalorder %s563_s5, %s383_s4  ;;  %p387_p6 = scmp.lt.u32.totalorder %s383_s4, %s563_s5 }
 0x1e2   :  { %p389_p7 = pnand %p387_p6, %p384_p5 }
 0x1e4   :  { %392 = shalt.err (!%p389_p7)
}
 0x1e5   :  { %240 = dma.vmem_to_hbm [thread:$0]  %s238_s14, 128, %s563_s5, [#allocation4]  }
 0x1e6   :  { %s424_s25 = smov [#allocation5]  }
 0x1e7   :  { %s247_s26 = sshll.u32 %s424_s25, 4  ;;  %s248_s26 = int_to_ptr.vmem [resolvable:$true] %s247_s26 }
 0x1e8   :  { %s393_s27 = scalar_lea.vmem %s248_s26, 128  ;;  %p398_p9 = scmp.lt.s32.totalorder %s248_s26, %s248_s26 }
 0x1e9   :  { %p394_p8 = scmp.ne.s32.totalorder %s248_s26, %s393_s27  ;;  %p399_p10 = scmp.lt.s32.totalorder %s393_s27, %s393_s27 }
 0x1eb   :  { %p400_p11 = por %p399_p10, %p398_p9 }
 0x1ed   :  { %p401_p12 = pnand %p400_p11, %p394_p8 }
 0x24f   :  { %v228_v49 = vpop.permute.xlu0 %227 }
 0x250   :  { %230 = vst.msk [vmem:[#allocation5] sm:$0xff] %vm42_vm2, %v228_v49 }
 0x251   :  { %404 = shalt.err (!%p401_p12)
}
 0x252   :  { %s405_s30 = scalar_lea.hbm %s564_s6, 128 }
 0x253   :  { %p406_p13 = scmp.ne.s32.totalorder %s564_s6, %s405_s30  ;;  %p409_p0 = scmp.lt.u32.totalorder %s405_s30, %s564_s6 }
 0x255   :  { %p411_p1 = pnand %p409_p0, %p406_p13 }
 0x257   :  { %414 = shalt.err (!%p411_p1)
}
 0x258   :  { %250 = dma.vmem_to_hbm [thread:$0]  %s248_s26, 128, %s564_s6, [#allocation6]  }
 0x259   :  { %415 = dma.done.wait [#allocation4], 128  }
 0x25a   :  { %416 = vsyncadd [#allocation4], 4294967168 }
 0x25b   :  { %417 = dma.done.wait [#allocation6], 128  }
 0x25c   :  { %418 = vsyncadd [#allocation6], 4294967168 }
 0x25d   :  { %257 = vsyncpa [#allocation4], 1 }
 0x25e   :  { %258 = vsyncpa [#allocation6], 1 }

</bundles_post_ra>
